<compile_context>
chip_gen: v6e
topology: v6e:2x2x1
jax: 0.10.0
libtpu: 0.0.40
codegen_flags: <defaults>
</compile_context>

<pallas_src>
import jax
import jax.numpy as jnp
from jax.experimental import pallas as pl
from jax.experimental.pallas import tpu as pltpu


def _round_up(n: int, m: int) -> int:
    return (n + m - 1) // m * m


def linear_kernel(x_ref, wt_ref, b_ref, o_ref):
    # out = x @ W_T + b — single MXU pass, bias broadcast-added in f32.
    acc = jnp.dot(x_ref[...], wt_ref[...], preferred_element_type=jnp.float32)
    o_ref[...] = (acc + b_ref[...]).astype(o_ref.dtype)


def simple_model_forward(x, weight, bias, *, batch_tile=1024, small_batch=1024):
    """x: (B, IN) f32, weight: (OUT, IN) (PyTorch nn.Linear layout), bias: (OUT,)."""
    B, IN = x.shape
    OUT = weight.shape[0]

    wt = weight.T                  # (IN, OUT): contract the shared last dim of x directly
    b2 = bias.reshape(1, OUT)      # (1, OUT): broadcasts over the batch tile

    if B <= small_batch:
        # Single full-array block: no padding, no trailing slice, grid=(1,).
        # Block dims equal the full array dims, so (8,128) alignment is exempt.
        return pl.pallas_call(
            linear_kernel,
            out_shape=jax.ShapeDtypeStruct((B, OUT), x.dtype),
            grid=(1,),
            in_specs=[
                pl.BlockSpec((B, IN), lambda i: (0, 0)),
                pl.BlockSpec((IN, OUT), lambda i: (0, 0)),
                pl.BlockSpec((1, OUT), lambda i: (0, 0)),
            ],
            out_specs=pl.BlockSpec((B, OUT), lambda i: (0, 0)),
        )(x, wt, b2)

    # Large-batch tiled path: pad batch only to a multiple of 8 sublanes.
    # The ragged last tile (cdiv grid) only ever reads rows that are never
    # reduced over and never returned, so OOB rows are harmless here.
    B_P8 = _round_up(B, 8)
    x_p = x if B_P8 == B else jnp.pad(x, ((0, B_P8 - B), (0, 0)))
    TM = min(batch_tile, B_P8)
    grid = (pl.cdiv(B_P8, TM),)

    out_p = pl.pallas_call(
        linear_kernel,
        out_shape=jax.ShapeDtypeStruct((B_P8, OUT), x.dtype),
        grid=grid,
        in_specs=[
            pl.BlockSpec((TM, IN), lambda i: (i, 0)),     # batch-tiled activations
            pl.BlockSpec((IN, OUT), lambda i: (0, 0)),    # weight resident across steps
            pl.BlockSpec((1, OUT), lambda i: (0, 0)),     # bias resident across steps
        ],
        out_specs=pl.BlockSpec((TM, OUT), lambda i: (i, 0)),
        compiler_params=pltpu.CompilerParams(
            dimension_semantics=("parallel",),            # shard batch across TCs (v7x)
        ),
    )(x_p, wt, b2)
    return out_p[:B]


if __name__ == "__main__":
    key = jax.random.PRNGKey(0)
    kx, kw, kb, kx2, kx3 = jax.random.split(key, 5)

    B, IN, OUT = 2, 10, 2
    x = jax.random.normal(kx, (B, IN), dtype=jnp.float32)
    # Deterministic init mimicking nn.Linear's uniform(-1/sqrt(IN), 1/sqrt(IN))
    bound = 1.0 / (IN ** 0.5)
    weight = jax.random.uniform(kw, (OUT, IN), minval=-bound, maxval=bound,
                                dtype=jnp.float32)
    bias = jax.random.uniform(kb, (OUT,), minval=-bound, maxval=bound,
                              dtype=jnp.float32)

    # Small-batch (single-block, unpadded) path.
    out = jax.block_until_ready(simple_model_forward(x, weight, bias))
    ref = x @ weight.T + bias
    assert out.shape == (B, OUT)
    assert jnp.allclose(out, ref, atol=1e-5, rtol=1e-5)

    # Another small-batch size, non-multiple of 8.
    B2 = 100
    x2 = jax.random.normal(kx2, (B2, IN), dtype=jnp.float32)
    out2 = jax.block_until_ready(simple_model_forward(x2, weight, bias))
    ref2 = x2 @ weight.T + bias
    assert out2.shape == (B2, OUT)
    assert jnp.allclose(out2, ref2, atol=1e-5, rtol=1e-5)

    # Large-batch tiled path with a ragged last tile (cdiv grid, 8-row pad only).
    B3 = 2500
    x3 = jax.random.normal(kx3, (B3, IN), dtype=jnp.float32)
    out3 = jax.block_until_ready(simple_model_forward(x3, weight, bias))
    ref3 = x3 @ weight.T + bias
    assert out3.shape == (B3, OUT)
    assert jnp.allclose(out3, ref3, atol=1e-5, rtol=1e-5)

    print("KERNEL_OK")
</pallas_src>

<mosaic_0001>
module attributes {stable_mosaic.version = 11 : i64} {
  func.func @linear_kernel(%arg0: i32, %arg1: memref<2x10xf32, #tpu.memory_space<vmem>>, %arg2: memref<10x2xf32, #tpu.memory_space<vmem>>, %arg3: memref<1x2xf32, #tpu.memory_space<vmem>>, %arg4: memref<2x2xf32, #tpu.memory_space<vmem>>) attributes {dimension_semantics = [#tpu.dimension_semantics<arbitrary>], iteration_bounds = array<i64: 1>, scalar_prefetch = 0 : i64, scratch_operands = 0 : i64, tpu.core_type = #tpu.core_type<tc>, window_params = [{pipeline_mode = #tpu.pipeline_mode<synchronous>, transform_indices = @transform_0, window_bounds = array<i64: 2, 10>}, {pipeline_mode = #tpu.pipeline_mode<synchronous>, transform_indices = @transform_1, window_bounds = array<i64: 10, 2>}, {pipeline_mode = #tpu.pipeline_mode<synchronous>, transform_indices = @transform_2, window_bounds = array<i64: 1, 2>}, {pipeline_mode = #tpu.pipeline_mode<synchronous>, transform_indices = @transform_3, window_bounds = array<i64: 2, 2>}]} {
    %c0 = arith.constant 0 : index
    %c0_0 = arith.constant 0 : index
    %0 = vector.load %arg1[%c0, %c0_0] : memref<2x10xf32, #tpu.memory_space<vmem>>, vector<2x10xf32>
    %c0_1 = arith.constant 0 : index
    %c0_2 = arith.constant 0 : index
    %1 = vector.load %arg2[%c0_1, %c0_2] : memref<10x2xf32, #tpu.memory_space<vmem>>, vector<10x2xf32>
    %cst = arith.constant dense<0.000000e+00> : vector<2x2xf32>
    %2 = tpu.matmul %0, %1, %cst {dimension_numbers = #tpu.dot_dimension_numbers<[1], [0], [0], [1], [0, 0, 1, 1], [], []>} : vector<2x10xf32>, vector<10x2xf32>, vector<2x2xf32> -> vector<2x2xf32>
    %c0_3 = arith.constant 0 : index
    %c0_4 = arith.constant 0 : index
    %3 = vector.load %arg3[%c0_3, %c0_4] : memref<1x2xf32, #tpu.memory_space<vmem>>, vector<1x2xf32>
    %4 = vector.broadcast %3 : vector<1x2xf32> to vector<2x2xf32>
    %5 = arith.addf %2, %4 : vector<2x2xf32>
    %c0_5 = arith.constant 0 : index
    %c0_6 = arith.constant 0 : index
    %6 = vector.load %arg4[%c0_5, %c0_6] : memref<2x2xf32, #tpu.memory_space<vmem>>, vector<2x2xf32>
    tpu.vector_store %arg4[%c0_5, %c0_6], %5 {strides = array<i32>} : memref<2x2xf32, #tpu.memory_space<vmem>>, vector<2x2xf32>,
    return
  }
  func.func @transform_0(%arg0: i32) -> (i32, i32) {
    %c0_i32 = arith.constant 0 : i32
    %c0_i32_0 = arith.constant 0 : i32
    %c0_i32_1 = arith.constant 0 : i32
    return %c0_i32, %c0_i32_0 : i32, i32
  }
  func.func @transform_1(%arg0: i32) -> (i32, i32) {
    %c0_i32 = arith.constant 0 : i32
    %c0_i32_0 = arith.constant 0 : i32
    %c0_i32_1 = arith.constant 0 : i32
    return %c0_i32, %c0_i32_0 : i32, i32
  }
  func.func @transform_2(%arg0: i32) -> (i32, i32) {
    %c0_i32 = arith.constant 0 : i32
    %c0_i32_0 = arith.constant 0 : i32
    %c0_i32_1 = arith.constant 0 : i32
    return %c0_i32, %c0_i32_0 : i32, i32
  }
  func.func @transform_3(%arg0: i32) -> (i32, i32) {
    %c0_i32 = arith.constant 0 : i32
    %c0_i32_0 = arith.constant 0 : i32
    %c0_i32_1 = arith.constant 0 : i32
    return %c0_i32, %c0_i32_0 : i32, i32
  }
}

</mosaic_0001>

<bundles_post_ra>
// kernel: tpu_custom_call.1
= control target key start
LH: loop header
LB: loop body
LE: loop exit
PB: predicated region body
PF: predicated region fallthrough
CT: control target
= control target key end

     0   :  { %vm29_vm0 = vcmask 1041408   ;;  %v157_v1 = vmov 0.0   ;;  %vm158_vm1 = vmmov 0   ;;  %vm25_vm2 = vcmask 80896   ;;  %s195_s0 = inlined_call_operand.vmem [shape: f32[2,10], index: 0, kind: input, shape index: {}]   ;;  %s196_s1 = inlined_call_operand.vmem [shape: f32[10,2], index: 1, kind: input, shape index: {}]   ;;  %s197_s2 = inlined_call_operand.vmem [shape: f32[1,2], index: 2, kind: input, shape index: {}]   ;;  %s198_s3 = inlined_call_operand.hbm [shape: f32[2,2], index: 3, kind: output, shape index: {}]  }
   0x1   :  { %v17_v0 = vld [vmem:[%s196_s1 + $0x8] sm:$0x3]  ;;  %125 = vmatprep.subr.mxu0 %v157_v1  ;;  %v16_v2 = vld [vmem:[%s196_s1] sm:$0xff]  ;;  %129 = vmatprep.mubr.msk.f32.mxu0 %vm158_vm1, %v157_v1 }
   0x2   :  { %126 = vmatpush3.msk.msra.mxu0 %vm29_vm0, %v17_v0  ;;  %v15_v3 = vld [vmem:[%s195_s0] sm:$0x3] }
   0x3   :  { %8 = vsyncpa [#allocation3], 0  ;;  %127 = vmatprep.subr.mxu0 %v157_v1  ;;  %v119_v4 = vld [vmem:[%s197_s2] ss:$0 sm:$0xff]  ;;  %s159_s20 = smov [#allocation2]   ;;  %vm103_vm3 = vcmask 9216  }
   0x4   :  { %128 = vmatpush3.msra.mxu0 %v16_v2  ;;  %s111_s21 = sshll.u32 %s159_s20, 4  ;;  %s112_s21 = int_to_ptr.vmem [resolvable:$true] %s111_s21 }
   0x5   :  { %130 = vmatmul.mubr.msk.f32.vlgmr.msra.gmra.mxu0 %vm25_vm2, %v15_v3  ;;  %s135_s1 = scalar_lea.vmem %s112_s21, 32  ;;  %p140_p1 = scmp.lt.s32.totalorder %s112_s21, %s112_s21 }
   0x6   :  { %p136_p0 = scmp.ne.s32.totalorder %s112_s21, %s135_s1  ;;  %p141_p2 = scmp.lt.s32.totalorder %s135_s1, %s135_s1 }
   0x8   :  { %p142_p3 = por %p141_p2, %p140_p1 }
   0xa   :  { %p143_p4 = pnand %p142_p3, %p136_p0 }
  0xc5   :  { %v99_v5 = vpop.f32.mrf.mxu0 }
  0xc6   :  { %v100_v6 = vadd.f32 %v119_v4, %v99_v5 }
  0xc7   :  { %v131_v7 = vpop.f32.mrf.mxu0 }
  0xc8   :  { %104 = vst.msk [vmem:[#allocation2] sm:$0x3] %vm103_vm3, %v100_v6 }
  0xc9   :  { %146 = shalt.err (!%p143_p4)
}
  0xca   :  { %114 = dma.vmem_to_hbm [thread:$0]  %s112_s21, 32, %s198_s3, [#allocation3]  }
  0xcb   :  { %155 = dma.done.wait [#allocation3], 32  }
  0xcc   :  { %156 = vsyncadd [#allocation3], 4294967264 }
  0xcd   :  { %118 = vsyncpa [#allocation3], 1 }

</bundles_post_ra>
